<compile_context>
chip_gen: v6e
topology: v6e:2x2x1
jax: 0.10.0
libtpu: 0.0.40
codegen_flags: <defaults>
</compile_context>

<pallas_src>
import functools

import jax
import jax.numpy as jnp
from jax.experimental import pallas as pl
from jax.experimental.pallas import tpu as pltpu


def _round_up(x: int, m: int) -> int:
    return ((x + m - 1) // m) * m


def _largest_divisor_tile(padded: int, base: int, cap: int) -> int:
    """Largest multiple of `base` that divides `padded` and is <= cap."""
    best = base
    q = padded // base
    for d in range(1, q + 1):
        if q % d == 0 and d * base <= cap:
            best = d * base
    return best


# ----------------------------------------------------------------------------
# Kernels
# ----------------------------------------------------------------------------
def _mlp_kernel_2d(x_ref, w_ref, b_ref, o_ref, *, activation):
    # x_ref: (tm, K) bf16 ; w_ref: (K, tn) bf16 ; b_ref: (1, tn) f32
    y = jnp.dot(x_ref[...], w_ref[...], preferred_element_type=jnp.float32)
    y = y + b_ref[...].astype(jnp.float32)
    if activation == "relu":
        y = jnp.maximum(y, 0.0)
    elif activation == "sigmoid":
        y = jax.nn.sigmoid(y)
    o_ref[...] = y.astype(o_ref.dtype)


def _mlp_kernel_3d(x_ref, w_ref, b_ref, o_ref, acc_ref, *, activation):
    # Split-K reduction with an f32 VMEM accumulator.
    k = pl.program_id(2)

    @pl.when(k == 0)
    def _():
        acc_ref[...] = jnp.zeros_like(acc_ref)

    acc_ref[...] += jnp.dot(
        x_ref[...], w_ref[...], preferred_element_type=jnp.float32
    )

    @pl.when(k == pl.num_programs(2) - 1)
    def _():
        y = acc_ref[...] + b_ref[...].astype(jnp.float32)
        if activation == "relu":
            y = jnp.maximum(y, 0.0)
        elif activation == "sigmoid":
            y = jax.nn.sigmoid(y)
        o_ref[...] = y.astype(o_ref.dtype)


# ----------------------------------------------------------------------------
# Wrapper
# ----------------------------------------------------------------------------
def mlp_layer(x, weight, bias, activation=None):
    """Pallas equivalent of MLPLayer.forward: act(x @ weight.T + bias).

    x:      (B, D_in)      float32
    weight: (D_out, D_in)  float32  (PyTorch nn.Linear layout)
    bias:   (D_out,)       float32
    """
    if activation not in (None, "relu", "sigmoid"):
        raise ValueError(f"unknown activation: {activation}")

    B, D_in = x.shape
    D_out, D_in_w = weight.shape
    assert D_in_w == D_in
    out_dtype = x.dtype
    out_elt = jnp.dtype(out_dtype).itemsize

    # --- VMEM budget (generation aware: scale tiles UP with capacity) ------
    try:
        vmem_cap = pltpu.get_tpu_info().vmem_capacity_bytes
    except Exception:  # pragma: no cover
        vmem_cap = 64 * 1024 * 1024  # conservative (v7x-sized) fallback
    budget = vmem_cap // 2

    # --- pad only to hardware granularity (bf16 sublane=16, lane=128) ------
    M_pad = _round_up(B, 16)
    N_pad = _round_up(D_out, 128)
    K_pad = _round_up(D_in, 128)

    def vmem_need(tm, tn, tk, collapsed):
        need = 2 * tm * tk * 2          # x tile (bf16), double-buffered
        need += 2 * tk * tn * 2         # w tile (bf16), double-buffered
        need += 2 * tm * tn * out_elt   # out tile, double-buffered
        need += 2 * tn * 4              # bias tile
        if not collapsed:
            need += tm * tn * 4         # f32 accumulator scratch
        return need

    def pick_tiles():
        # Prefer collapsing K entirely (2-D grid, no accumulator), then big tn,
        # then big tm; all tiles are exact divisors of the padded dims.
        tk_caps = [K_pad, 2048, 1024, 512, 256, 128]
        tn_caps = [2048, 1024, 512, 256, 128]
        tm_caps = [512, 256, 128, 64, 32, 16]
        for tk_cap in tk_caps:
            tk = _largest_divisor_tile(K_pad, 128, min(K_pad, tk_cap))
            collapsed = tk == K_pad
            for tn_cap in tn_caps:
                tn = _largest_divisor_tile(N_pad, 128, min(N_pad, tn_cap))
                for tm_cap in tm_caps:
                    tm = _largest_divisor_tile(M_pad, 16, min(M_pad, tm_cap))
                    if vmem_need(tm, tn, tk, collapsed) <= budget:
                        return tm, tn, tk
        return 16, 128, 128

    tm, tn, tk = pick_tiles()

    # v7x has 2 TensorCores sharded over "parallel" axes: make sure there are
    # >= 2 blocks along a parallel axis when the problem allows it.
    if (M_pad // tm) * (N_pad // tn) == 1:
        if N_pad // 128 >= 2:
            tn = _largest_divisor_tile(N_pad, 128, N_pad // 2)
        elif M_pad // 16 >= 2:
            tm = _largest_divisor_tile(M_pad, 16, M_pad // 2)

    collapsed = tk == K_pad

    # --- operand preparation (bf16, minimal padding) ------------------------
    # TODO(synk): in a real model, cache the bf16 / transposed / padded weight
    # across forward calls instead of re-materializing it per call.
    x_p = x.astype(jnp.bfloat16)
    if (M_pad, K_pad) != (B, D_in):
        x_p = jnp.pad(x_p, ((0, M_pad - B), (0, K_pad - D_in)))

    w_t = weight.T.astype(jnp.bfloat16)           # one fused transpose+cast pass
    if (K_pad, N_pad) != (D_in, D_out):
        w_t = jnp.pad(w_t, ((0, K_pad - D_in), (0, N_pad - D_out)))

    b_p = bias.astype(jnp.float32)
    if N_pad != D_out:
        b_p = jnp.pad(b_p, (0, N_pad - D_out))
    b2 = b_p.reshape(1, N_pad)

    # --- cost estimate & VMEM limit -----------------------------------------
    need = vmem_need(tm, tn, tk, collapsed)
    vmem_limit = min(int(0.9 * vmem_cap), max(2 * need, 32 * 1024 * 1024))

    cost = pl.CostEstimate(
        flops=2 * B * D_in * D_out,
        transcendentals=(B * D_out if activation == "sigmoid" else 0),
        bytes_accessed=2 * (B * D_in + D_in * D_out) + 4 * (D_out + B * D_out),
    )

    # --- grid / specs --------------------------------------------------------
    if collapsed:
        grid = (M_pad // tm, N_pad // tn)
        kernel = functools.partial(_mlp_kernel_2d, activation=activation)
        in_specs = [
            pl.BlockSpec((tm, K_pad), lambda i, j: (i, 0)),   # x
            pl.BlockSpec((K_pad, tn), lambda i, j: (0, j)),   # weight (K, N)
            pl.BlockSpec((1, tn), lambda i, j: (0, j)),       # bias
        ]
        out_specs = pl.BlockSpec((tm, tn), lambda i, j: (i, j))
        scratch_shapes = []
        dims = ("parallel", "parallel")
    else:
        grid = (M_pad // tm, N_pad // tn, K_pad // tk)
        kernel = functools.partial(_mlp_kernel_3d, activation=activation)
        in_specs = [
            pl.BlockSpec((tm, tk), lambda i, j, k: (i, k)),   # x
            pl.BlockSpec((tk, tn), lambda i, j, k: (k, j)),   # weight (K, N)
            pl.BlockSpec((1, tn), lambda i, j, k: (0, j)),    # bias
        ]
        out_specs = pl.BlockSpec((tm, tn), lambda i, j, k: (i, j))
        scratch_shapes = [pltpu.VMEM((tm, tn), jnp.float32)]
        dims = ("parallel", "parallel", "arbitrary")

    out_p = pl.pallas_call(
        kernel,
        out_shape=jax.ShapeDtypeStruct((M_pad, N_pad), out_dtype),
        grid_spec=pltpu.PrefetchScalarGridSpec(
            num_scalar_prefetch=0,
            grid=grid,
            in_specs=in_specs,
            out_specs=out_specs,
            scratch_shapes=scratch_shapes,
        ),
        compiler_params=pltpu.CompilerParams(
            dimension_semantics=dims,
            vmem_limit_bytes=vmem_limit,
        ),
        cost_estimate=cost,
    )(x_p, w_t, b2)

    # Slice away padding (lane-dense kernel output).
    return out_p[:B, :D_out]


def _ref_mlp(x, weight, bias, activation=None):
    y = x @ weight.T + bias
    if activation == "relu":
        y = jnp.maximum(y, 0.0)
    elif activation == "sigmoid":
        y = jax.nn.sigmoid(y)
    return y


if __name__ == "__main__":
    key = jax.random.PRNGKey(0)
    k_x, k_w, k_b = jax.random.split(key, 3)

    batch, input_dim, output_dim = 8, 32, 32

    x = jax.random.normal(k_x, (batch, input_dim), dtype=jnp.float32)
    # Deterministic "nn.Linear"-like init (uniform in +/- 1/sqrt(fan_in)).
    bound = 1.0 / (input_dim ** 0.5)
    weight = jax.random.uniform(
        k_w, (output_dim, input_dim), dtype=jnp.float32,
        minval=-bound, maxval=bound)
    bias = jax.random.uniform(
        k_b, (output_dim,), dtype=jnp.float32, minval=-bound, maxval=bound)

    ok = True
    for act in (None, "relu", "sigmoid"):
        out = jax.block_until_ready(mlp_layer(x, weight, bias, activation=act))
        ref = _ref_mlp(x, weight, bias, activation=act)
        # bf16 operands (f32 accumulation) -> bf16-level tolerance vs f32 ref.
        if out.shape != ref.shape or not jnp.allclose(out, ref, atol=2e-2, rtol=2e-2):
            ok = False

    if ok:
        print("KERNEL_OK")
</pallas_src>

<mosaic_0001>
module attributes {stable_mosaic.version = 11 : i64} {
  func.func @_mlp_kernel_2d(%arg0: i32, %arg1: i32, %arg2: memref<16x128xbf16, #tpu.memory_space<vmem>>, %arg3: memref<128x128xbf16, #tpu.memory_space<vmem>>, %arg4: memref<1x128xf32, #tpu.memory_space<vmem>>, %arg5: memref<16x128xf32, #tpu.memory_space<vmem>>) attributes {dimension_semantics = [#tpu.dimension_semantics<parallel>, #tpu.dimension_semantics<parallel>], iteration_bounds = array<i64: 1, 1>, scalar_prefetch = 0 : i64, scratch_operands = 0 : i64, tpu.core_type = #tpu.core_type<tc>, window_params = [{transform_indices = @transform_0, window_bounds = array<i64: 16, 128>}, {transform_indices = @transform_1, window_bounds = array<i64: 128, 128>}, {transform_indices = @transform_2, window_bounds = array<i64: 1, 128>}, {transform_indices = @transform_3, window_bounds = array<i64: 16, 128>}]} {
    %c0 = arith.constant 0 : index
    %c0_0 = arith.constant 0 : index
    %0 = vector.load %arg2[%c0, %c0_0] : memref<16x128xbf16, #tpu.memory_space<vmem>>, vector<16x128xbf16>
    %c0_1 = arith.constant 0 : index
    %c0_2 = arith.constant 0 : index
    %1 = vector.load %arg3[%c0_1, %c0_2] : memref<128x128xbf16, #tpu.memory_space<vmem>>, vector<128x128xbf16>
    %cst = arith.constant dense<0.000000e+00> : vector<16x128xf32>
    %2 = tpu.matmul %0, %1, %cst {dimension_numbers = #tpu.dot_dimension_numbers<[1], [0], [0], [1], [0, 0, 1, 1], [], []>} : vector<16x128xbf16>, vector<128x128xbf16>, vector<16x128xf32> -> vector<16x128xf32>
    %c0_3 = arith.constant 0 : index
    %c0_4 = arith.constant 0 : index
    %3 = vector.load %arg4[%c0_3, %c0_4] : memref<1x128xf32, #tpu.memory_space<vmem>>, vector<1x128xf32>
    %4 = vector.broadcast %3 : vector<1x128xf32> to vector<16x128xf32>
    %5 = arith.addf %2, %4 : vector<16x128xf32>
    %c0_5 = arith.constant 0 : index
    %c0_6 = arith.constant 0 : index
    %6 = vector.load %arg5[%c0_5, %c0_6] : memref<16x128xf32, #tpu.memory_space<vmem>>, vector<16x128xf32>
    tpu.vector_store %arg5[%c0_5, %c0_6], %5 {strides = array<i32>} : memref<16x128xf32, #tpu.memory_space<vmem>>, vector<16x128xf32>,
    return
  }
  func.func @transform_0(%arg0: i32, %arg1: i32) -> (i32, i32) {
    %c0_i32 = arith.constant 0 : i32
    %c0_i32_0 = arith.constant 0 : i32
    return %arg0, %c0_i32 : i32, i32
  }
  func.func @transform_1(%arg0: i32, %arg1: i32) -> (i32, i32) {
    %c0_i32 = arith.constant 0 : i32
    %c0_i32_0 = arith.constant 0 : i32
    return %c0_i32, %arg1 : i32, i32
  }
  func.func @transform_2(%arg0: i32, %arg1: i32) -> (i32, i32) {
    %c0_i32 = arith.constant 0 : i32
    %c0_i32_0 = arith.constant 0 : i32
    return %c0_i32, %arg1 : i32, i32
  }
  func.func @transform_3(%arg0: i32, %arg1: i32) -> (i32, i32) {
    %c0_i32 = arith.constant 0 : i32
    return %arg0, %arg1 : i32, i32
  }
}

</mosaic_0001>

<bundles_post_ra>
// kernel: tpu_custom_call.1
= control target key start
LH: loop header
LB: loop body
LE: loop exit
PB: predicated region body
PF: predicated region fallthrough
CT: control target
= control target key end

     0   :  { %8 = vsyncpa [#allocation3], 0  ;;  %s348_s0 = inlined_call_operand.hbm [shape: bf16[16,128], index: 0, kind: input, shape index: {}]   ;;  %s349_s1 = inlined_call_operand.hbm [shape: bf16[128,128], index: 1, kind: input, shape index: {}]   ;;  %s350_s2 = inlined_call_operand.vmem [shape: f32[1,128], index: 2, kind: input, shape index: {}]   ;;  %s351_s3 = inlined_call_operand.hbm [shape: f32[16,128], index: 3, kind: output, shape index: {}]  }
   0x1   :  { %9 = vsyncpa [#allocation6], 0 }
   0x2   :  { %10 = vsyncpa [#allocation4], 0  ;;  %s307_s12 = smov [#allocation2]  }
   0x3   :  { %s16_s13 = sshll.u32 %s307_s12, 4  ;;  %s17_s13 = int_to_ptr.vmem [resolvable:$true] %s16_s13 }
   0x4   :  { %s249_s14 = scalar_lea.vmem %s17_s13, 128  ;;  %p254_p1 = scmp.lt.s32.totalorder %s17_s13, %s17_s13 }
   0x5   :  { %p250_p0 = scmp.ne.s32.totalorder %s17_s13, %s249_s14  ;;  %p255_p2 = scmp.lt.s32.totalorder %s249_s14, %s249_s14 }
   0x7   :  { %p256_p3 = por %p255_p2, %p254_p1 }
   0x9   :  { %p257_p4 = pnand %p256_p3, %p250_p0 }
   0xb   :  { %260 = shalt.err (!%p257_p4)
}
   0xc   :  { %s308_s15 = smov 64   ;;  %s309_s16 = smov 4  }
   0xd   :  { %22 = dma.hbm_to_vmem [thread:$0]  %s348_s0, 128, %s17_s13, [#allocation3], %s308_s15, %s308_s15, %s309_s16  }
   0xe   :  { %s310_s19 = smov [#allocation5]  }
   0xf   :  { %s28_s20 = sshll.u32 %s310_s19, 4  ;;  %s29_s20 = int_to_ptr.vmem [resolvable:$true] %s28_s20 }
  0x10   :  { %s269_s21 = scalar_lea.vmem %s29_s20, 1024  ;;  %p274_p6 = scmp.lt.s32.totalorder %s29_s20, %s29_s20 }
  0x11   :  { %p270_p5 = scmp.ne.s32.totalorder %s29_s20, %s269_s21  ;;  %p275_p7 = scmp.lt.s32.totalorder %s269_s21, %s269_s21 }
  0x13   :  { %p276_p8 = por %p275_p7, %p274_p6 }
  0x15   :  { %p277_p9 = pnand %p276_p8, %p270_p5 }
  0x17   :  { %280 = shalt.err (!%p277_p9)
}
  0x18   :  { %34 = dma.hbm_to_vmem [thread:$0]  %s349_s1, 1024, %s29_s20, [#allocation6], %s308_s15, %s308_s15, %s309_s16  }
  0x19   :  { %301 = dma.done.wait [#allocation3], 128  }
  0x1a   :  { %302 = vsyncadd [#allocation3], 4294967168 }
  0x1b   :  { %303 = dma.done.wait [#allocation6], 1024  }
  0x1c   :  { %304 = vsyncadd [#allocation6], 4294966272  ;;  %v311_v0 = vmov 0.0   ;;  %vm312_vm0 = vmmov 0   ;;  %v232_v1 = vld [vmem:[#allocation5 + $0x38] sm:$0xff]   ;;  %v233_v2 = vld [vmem:[#allocation5 + $0x30] sm:$0xff]  }
  0x1d   :  { %203 = vmatprep.subr.bf16.mxu0 %v311_v0  ;;  %219 = vmatprep.mubr.msk.bf16.mxu0 %vm312_vm0, %v311_v0  ;;  %v234_v3 = vld [vmem:[#allocation5 + $0x28] sm:$0xff]   ;;  %v235_v4 = vld [vmem:[#allocation5 + $0x20] sm:$0xff]   ;;  %v236_v5 = vld [vmem:[#allocation5 + $0x18] sm:$0xff]   ;;  %s313_s24 = smov [#allocation7]  }
  0x1e   :  { %204 = vmatpush3.bf16.msra.mxu0 %v232_v1  ;;  %v237_v6 = vld [vmem:[#allocation5 + $0x10] sm:$0xff]   ;;  %v238_v7 = vld [vmem:[#allocation5 + $0x8] sm:$0xff]   ;;  %v239_v8 = vld [vmem:[#allocation5] sm:$0xff]   ;;  %s171_s25 = sshll.u32 %s313_s24, 4  ;;  %s172_s25 = int_to_ptr.vmem [resolvable:$true] %s171_s25 }
  0x1f   :  { %205 = vmatprep.subr.bf16.mxu0 %v311_v0  ;;  %v240_v9 = vld [vmem:[#allocation2] sm:$0xff]   ;;  %s281_s26 = scalar_lea.vmem %s172_s25, 256  ;;  %p286_p11 = scmp.lt.s32.totalorder %s172_s25, %s172_s25 }
  0x20   :  { %v184_v10 = vld [vmem:[%s350_s2] ss:$0 sm:$0xff]  ;;  %p282_p10 = scmp.ne.s32.totalorder %s172_s25, %s281_s26  ;;  %p287_p12 = scmp.lt.s32.totalorder %s281_s26, %s281_s26 }
  0x22   :  { %206 = vmatpush3.bf16.msra.mxu0 %v233_v2  ;;  %p288_p13 = por %p287_p12, %p286_p11 }
  0x23   :  { %207 = vmatprep.subr.bf16.mxu0 %v311_v0 }
  0x24   :  { %p289_p0 = pnand %p288_p13, %p282_p10 }
  0x26   :  { %208 = vmatpush3.bf16.msra.mxu0 %v234_v3 }
  0x27   :  { %209 = vmatprep.subr.bf16.mxu0 %v311_v0 }
  0x2a   :  { %210 = vmatpush3.bf16.msra.mxu0 %v235_v4 }
  0x2b   :  { %211 = vmatprep.subr.bf16.mxu0 %v311_v0 }
  0x2e   :  { %212 = vmatpush3.bf16.msra.mxu0 %v236_v5 }
  0x2f   :  { %213 = vmatprep.subr.bf16.mxu0 %v311_v0 }
  0x32   :  { %214 = vmatpush3.bf16.msra.mxu0 %v237_v6 }
  0x33   :  { %215 = vmatprep.subr.bf16.mxu0 %v311_v0 }
  0x36   :  { %216 = vmatpush3.bf16.msra.mxu0 %v238_v7 }
  0x37   :  { %217 = vmatprep.subr.bf16.mxu0 %v311_v0 }
  0x3a   :  { %218 = vmatpush3.bf16.msra.mxu0 %v239_v8 }
  0x3d   :  { %220 = vmatmul.mubr.bf16.vlgmr.msra.gmra.mxu0 %v240_v9 }
  0xfd   :  { %v157_v11 = vpop.f32.mrf.mxu0 }
  0xfe   :  { %v158_v12 = vadd.f32 %v184_v10, %v157_v11 }
  0xff   :  { %v221_v13 = vpop.f32.mrf.mxu0 }
 0x100   :  { %164 = vst [vmem:[#allocation7] sm:$0xff] %v158_v12 }
 0x101   :  { %v160_v14 = vpop.f32.mrf.mxu0 }
 0x102   :  { %v161_v15 = vadd.f32 %v184_v10, %v160_v14 }
 0x103   :  { %v222_v16 = vpop.f32.mrf.mxu0 }
 0x104   :  { %165 = vst [vmem:[#allocation7 + $0x8] sm:$0xff] %v161_v15 }
 0x105   :  { %292 = shalt.err (!%p289_p0)
}
 0x106   :  { %s314_s27 = smov 128   ;;  %s315_s2 = smov 8  }
 0x107   :  { %177 = dma.vmem_to_hbm [thread:$0]  %s172_s25, 256, %s351_s3, [#allocation4], %s314_s27, %s314_s27, %s315_s2  }
 0x108   :  { %305 = dma.done.wait [#allocation4], 256  }
 0x109   :  { %306 = vsyncadd [#allocation4], 4294967040 }
 0x10a   :  { %181 = vsyncpa [#allocation3], 1 }
 0x10b   :  { %182 = vsyncpa [#allocation6], 1 }
 0x10c   :  { %183 = vsyncpa [#allocation4], 1 }

</bundles_post_ra>
